<compile_context>
chip_gen: v7x
topology: tpu7x:2x2x1
jax: 0.10.0
libtpu: 0.0.40
codegen_flags: <defaults>
</compile_context>

<pallas_src>
import functools

import jax
import jax.numpy as jnp
from jax.experimental import pallas as pl
from jax.experimental.pallas import tpu as pltpu


def _prompt_assemble_kernel(prefix_ref, ctx_ref, suffix_ref, out_ref):
    """Assemble a block of class prompts: [prefix | ctx (broadcast) | suffix].

    prefix_ref : (C_BLK, 1, D)           per-class SOS embeddings
    ctx_ref    : (n_ctx, D)              shared learnable context (same block every step)
    suffix_ref : (C_BLK, S-1-n_ctx, D)   per-class class-name + EOS + pad embeddings
    out_ref    : (C_BLK, S, D)           assembled prompt rows for this class block
    """
    out_dtype = out_ref.dtype
    c_blk, _, d = out_ref.shape
    n_ctx = ctx_ref.shape[0]

    prefix = prefix_ref[...].astype(out_dtype)                       # (c_blk, 1, d)
    ctx_b = jnp.broadcast_to(
        ctx_ref[...].astype(out_dtype)[None, :, :], (c_blk, n_ctx, d))
    suffix = suffix_ref[...].astype(out_dtype)                       # (c_blk, suf, d)

    # Build the full (c_blk, S, d) value in registers and write it with one unmasked
    # full-tile store (token offsets 0 / 1 / 1+n_ctx are sublane-misaligned, so slice
    # stores would each be masked vst.msk read-modify-write passes).
    out_ref[...] = jnp.concatenate([prefix, ctx_b, suffix], axis=1)


def _detect_num_tensorcores():
    """Best-effort TensorCore-per-device count (v7x = 2, v5e/v6e = 1)."""
    try:
        dev = jax.devices()[0]
        kind = (getattr(dev, "device_kind", "") or "").lower()
        if "v7" in kind:
            return 2
        cores = getattr(dev, "num_cores", None)
        if isinstance(cores, int) and cores > 0:
            return cores
    except Exception:
        pass
    return 1


def _pick_class_block(n_cls, seq_len, ctx_dim, itemsize, num_cores,
                      target_tile_bytes=4 << 20,     # ~4 MiB output tile
                      vmem_budget_bytes=24 << 20):   # double-buffered footprint cap
    """Pick how many class rows to assemble per grid step (and the step count)."""
    row_bytes = seq_len * ctx_dim * itemsize
    c_blk = max(1, min(n_cls, target_tile_bytes // row_bytes))
    # prefix+suffix input blocks together ~= one output block; x2 for double buffering.
    while c_blk > 1 and 4 * c_blk * row_bytes > vmem_budget_bytes:
        c_blk //= 2

    n_steps = pl.cdiv(n_cls, c_blk)
    if num_cores > 1 and n_cls >= num_cores:
        # Multi-TC chips (v7x): at least one step per core, and an even multiple of the
        # core count so the cores finish together (no straggler remainder block).
        n_steps = max(n_steps, num_cores)
        n_steps = num_cores * pl.cdiv(n_steps, num_cores)
        n_steps = min(n_steps, n_cls)
    # Re-balance the rows as evenly as possible across the chosen step count.
    c_blk = pl.cdiv(n_cls, n_steps)
    n_steps = pl.cdiv(n_cls, c_blk)
    return int(c_blk), int(n_steps)


def prompt_learner_forward(token_prefix, ctx, token_suffix, *,
                           class_block=None, out_dtype=None, num_cores=None):
    """Pallas equivalent of PromptLearner.forward() for CLASS_TOKEN_POSITION='end',
    generic (non-class-specific) context.

    Output dtype defaults to the frozen-embedding dtype (CoOp's reference keeps all
    tensors in the CLIP dtype); pass out_dtype explicitly to override.
    """
    n_cls, one, ctx_dim = token_prefix.shape
    assert one == 1
    n_ctx, ctx_dim_ctx = ctx.shape
    assert ctx_dim_ctx == ctx_dim
    suf_len = token_suffix.shape[1]
    assert token_suffix.shape == (n_cls, suf_len, ctx_dim)
    seq_len = 1 + n_ctx + suf_len

    if out_dtype is None:
        out_dtype = token_prefix.dtype            # CLIP embedding dtype, not result_type
    out_dtype = jnp.dtype(out_dtype)
    itemsize = out_dtype.itemsize

    # Hoist the ctx cast out of the per-step kernel body (no per-step VPU cast pass).
    ctx = ctx.astype(out_dtype)
    token_prefix = token_prefix.astype(out_dtype)
    token_suffix = token_suffix.astype(out_dtype)

    if num_cores is None:
        num_cores = _detect_num_tensorcores()

    if class_block is not None:
        c_blk = int(class_block)
        n_steps = int(pl.cdiv(n_cls, c_blk))
    else:
        c_blk, n_steps = _pick_class_block(n_cls, seq_len, ctx_dim, itemsize, num_cores)
    grid = (n_steps,)

    # Scoped-VMEM limit sized from the actual double-buffered footprint
    # (prefix+suffix blocks ~= one output block; x2 for double buffering), with
    # headroom, clamped to stay safe on v7x's 64 MiB physical VMEM.
    footprint = 4 * c_blk * seq_len * ctx_dim * itemsize
    vmem_limit = int(min(max(2 * footprint, 32 << 20), 64 << 20))

    bytes_read = (token_prefix.size + ctx.size + token_suffix.size) * itemsize
    bytes_written = n_cls * seq_len * ctx_dim * itemsize

    return pl.pallas_call(
        _prompt_assemble_kernel,
        out_shape=jax.ShapeDtypeStruct((n_cls, seq_len, ctx_dim), out_dtype),
        grid=grid,
        in_specs=[
            # per-class-block prefix tile
            pl.BlockSpec((c_blk, 1, ctx_dim), lambda i: (i, 0, 0)),
            # shared context: constant index_map -> DMA'd once, reused every step
            pl.BlockSpec((n_ctx, ctx_dim), lambda i: (0, 0)),
            # per-class-block suffix tile
            pl.BlockSpec((c_blk, suf_len, ctx_dim), lambda i: (i, 0, 0)),
        ],
        out_specs=pl.BlockSpec((c_blk, seq_len, ctx_dim), lambda i: (i, 0, 0)),
        compiler_params=pltpu.CompilerParams(
            dimension_semantics=("parallel",),
            vmem_limit_bytes=vmem_limit),
        cost_estimate=pl.CostEstimate(
            flops=0, transcendentals=0,
            bytes_accessed=int(bytes_read + bytes_written)),
    )(token_prefix, ctx, token_suffix)


if __name__ == "__main__":
    # Small, CoOp-consistent shapes.
    n_cls = 8        # number of class names
    n_ctx = 4        # cfg.COOP.N_CTX
    ctx_dim = 128    # clip_model.ln_final.weight.shape[0]
    seq_len = 16     # tokenized prompt length (CLIP uses 77; small here)
    suf_len = seq_len - 1 - n_ctx

    key = jax.random.PRNGKey(0)
    k_ctx, k_pre, k_suf = jax.random.split(key, 3)

    # Deterministic synthetic parameters / buffers (shapes as in __init__):
    #   ctx ~ N(0, 0.02)  -> (n_ctx, ctx_dim)          [generic context, CSC=False]
    #   token_prefix      -> (n_cls, 1, ctx_dim)        [SOS embedding]
    #   token_suffix      -> (n_cls, seq_len-1-n_ctx, ctx_dim)
    # TODO(synk): CLIP tokenizer / token_embedding lookup has no Pallas equivalent here;
    #             the frozen embedding buffers are synthesized with random values.
    # TODO(synk): class_token_position 'middle'/'front' needs per-class dynamic name_len
    #             slicing (ragged shapes); only the default 'end' layout is implemented.
    dtype = jnp.float32
    ctx = (0.02 * jax.random.normal(k_ctx, (n_ctx, ctx_dim))).astype(dtype)
    token_prefix = jax.random.normal(k_pre, (n_cls, 1, ctx_dim)).astype(dtype)
    token_suffix = jax.random.normal(k_suf, (n_cls, suf_len, ctx_dim)).astype(dtype)

    prompts = prompt_learner_forward(token_prefix, ctx, token_suffix)
    prompts = jax.block_until_ready(prompts)

    # Reference (plain JAX): expand ctx over classes and concatenate along token axis.
    ctx_expanded = jnp.broadcast_to(ctx[None, :, :], (n_cls, n_ctx, ctx_dim))
    ref = jnp.concatenate([token_prefix, ctx_expanded, token_suffix], axis=1)

    assert prompts.shape == (n_cls, seq_len, ctx_dim), prompts.shape
    assert prompts.dtype == dtype
    assert jnp.allclose(prompts, ref), "Pallas output mismatch vs reference concat"

    print("KERNEL_OK")
</pallas_src>

<mosaic_0001>
module attributes {stable_mosaic.version = 11 : i64} {
  func.func @_prompt_assemble_kernel(%arg0: i32, %arg1: memref<8x1x128xf32, #tpu.memory_space<vmem>>, %arg2: memref<4x128xf32, #tpu.memory_space<vmem>>, %arg3: memref<8x11x128xf32, #tpu.memory_space<vmem>>, %arg4: memref<8x16x128xf32, #tpu.memory_space<vmem>>) attributes {dimension_semantics = [#tpu.dimension_semantics<parallel>], iteration_bounds = array<i64: 1>, scalar_prefetch = 0 : i64, scratch_operands = 0 : i64, tpu.core_type = #tpu.core_type<tc>, window_params = [{transform_indices = @transform_0, window_bounds = array<i64: 8, 1, 128>}, {pipeline_mode = #tpu.pipeline_mode<synchronous>, transform_indices = @transform_1, window_bounds = array<i64: 4, 128>}, {transform_indices = @transform_2, window_bounds = array<i64: 8, 11, 128>}, {transform_indices = @transform_3, window_bounds = array<i64: 8, 16, 128>}]} {
    %c0 = arith.constant 0 : index
    %c0_0 = arith.constant 0 : index
    %c0_1 = arith.constant 0 : index
    %0 = vector.load %arg1[%c0, %c0_0, %c0_1] : memref<8x1x128xf32, #tpu.memory_space<vmem>>, vector<8x1x128xf32>
    %c0_2 = arith.constant 0 : index
    %c0_3 = arith.constant 0 : index
    %1 = vector.load %arg2[%c0_2, %c0_3] : memref<4x128xf32, #tpu.memory_space<vmem>>, vector<4x128xf32>
    %2 = vector.shape_cast %1 : vector<4x128xf32> to vector<1x4x128xf32>
    %3 = vector.shape_cast %2 : vector<1x4x128xf32> to vector<1x4x128xf32>
    %4 = vector.broadcast %3 : vector<1x4x128xf32> to vector<8x4x128xf32>
    %c0_4 = arith.constant 0 : index
    %c0_5 = arith.constant 0 : index
    %c0_6 = arith.constant 0 : index
    %5 = vector.load %arg3[%c0_4, %c0_5, %c0_6] : memref<8x11x128xf32, #tpu.memory_space<vmem>>, vector<8x11x128xf32>
    %6 = tpu.concatenate %0, %4, %5 in 1 : vector<8x1x128xf32>, vector<8x4x128xf32>, vector<8x11x128xf32> -> vector<8x16x128xf32>
    %c0_7 = arith.constant 0 : index
    %c0_8 = arith.constant 0 : index
    %c0_9 = arith.constant 0 : index
    %7 = vector.load %arg4[%c0_7, %c0_8, %c0_9] : memref<8x16x128xf32, #tpu.memory_space<vmem>>, vector<8x16x128xf32>
    tpu.vector_store %arg4[%c0_7, %c0_8, %c0_9], %6 {strides = array<i32>} : memref<8x16x128xf32, #tpu.memory_space<vmem>>, vector<8x16x128xf32>,
    return
  }
  func.func @transform_0(%arg0: i32) -> (i32, i32, i32) {
    %c0_i32 = arith.constant 0 : i32
    %c0_i32_0 = arith.constant 0 : i32
    %c0_i32_1 = arith.constant 0 : i32
    return %arg0, %c0_i32, %c0_i32_0 : i32, i32, i32
  }
  func.func @transform_1(%arg0: i32) -> (i32, i32) {
    %c0_i32 = arith.constant 0 : i32
    %c0_i32_0 = arith.constant 0 : i32
    %c0_i32_1 = arith.constant 0 : i32
    return %c0_i32, %c0_i32_0 : i32, i32
  }
  func.func @transform_2(%arg0: i32) -> (i32, i32, i32) {
    %c0_i32 = arith.constant 0 : i32
    %c0_i32_0 = arith.constant 0 : i32
    %c0_i32_1 = arith.constant 0 : i32
    return %arg0, %c0_i32, %c0_i32_0 : i32, i32, i32
  }
  func.func @transform_3(%arg0: i32) -> (i32, i32, i32) {
    %c0_i32 = arith.constant 0 : i32
    %c0_i32_0 = arith.constant 0 : i32
    %c0_i32_1 = arith.constant 0 : i32
    return %arg0, %c0_i32, %c0_i32_0 : i32, i32, i32
  }
}

</mosaic_0001>

<bundles_post_ra>
// kernel: tpu_custom_call.1
= control target key start
LH: loop header
LB: loop body
LE: loop exit
PB: predicated region body
PF: predicated region fallthrough
CT: control target
= control target key end

     0   :  { %vm59_vm0 = vcmask 1044480   ;;  %vm100_vm1 = vcmask 1040384   ;;  %s320_s0 = inlined_call_operand.vmem [shape: f32[8,1,128], index: 0, kind: input, shape index: {}]   ;;  %s321_s1 = inlined_call_operand.vmem [shape: f32[4,128], index: 1, kind: input, shape index: {}]   ;;  %s322_s2 = inlined_call_operand.vmem [shape: f32[8,11,128], index: 2, kind: input, shape index: {}]   ;;  %s323_s3 = inlined_call_operand.hbm [shape: f32[8,16,128], index: 3, kind: output, shape index: {}]  }
   0x1   :  { %v15_v0 = vld [vmem:[%s320_s0] sm:$0x1]  ;;  %v25_v5 = vld [vmem:[%s322_s2 + $0x8] sm:$0x7]  ;;  %v26_v6 = vld [vmem:[%s322_s2 + $0x10] sm:$0xff] }
   0x2   :  { %v23_v1 = vld [vmem:[%s321_s1] sm:$0xf]  ;;  %v61_v7 = vrot.slane %v25_v5, 3  ;;  %v63_v9 = vrot.slane %v26_v6, 3  ;;  %v27_v10 = vld [vmem:[%s322_s2 + $0x18] sm:$0x7] }
   0x3   :  { %v24_v2 = vld [vmem:[%s322_s2] sm:$0xff]  ;;  %v208_v3 = vrot.slane %v23_v1, 7  ;;  %v64_v13 = vrot.slane %v27_v10, 3  ;;  %v29_v16 = vld [vmem:[%s322_s2 + $0x28] sm:$0x7]  ;;  %v30_v22 = vld [vmem:[%s322_s2 + $0x30] sm:$0xff] }
   0x4   :  { %v60_v4 = vrot.slane %v24_v2, 3  ;;  %v16_v8 = vld [vmem:[%s320_s0 + $0x1] sm:$0x1]  ;;  %v17_v14 = vld [vmem:[%s320_s0 + $0x2] sm:$0x1]  ;;  %v67_v26 = vrot.slane %v29_v16, 3 }
   0x5   :  { %v101_v11 = vsel %vm100_vm1, %v15_v0, %v208_v3  ;;  %v102_v12 = vsel %vm100_vm1, %v16_v8, %v208_v3  ;;  %v28_v15 = vld [vmem:[%s322_s2 + $0x20] sm:$0xff]  ;;  %v31_v23 = vld [vmem:[%s322_s2 + $0x38] sm:$0x7]  ;;  %v65_v24 = vsel %vm59_vm0, %v63_v9, %v64_v13  ;;  %v103_v25 = vsel %vm100_vm1, %v17_v14, %v208_v3  ;;  %v34_v30 = vld [vmem:[%s322_s2 + $0x50] sm:$0xff] }
   0x6   :  { %v109_v17 = vsel %vm59_vm0, %v101_v11, %v60_v4  ;;  %v62_v18 = vsel %vm59_vm0, %v60_v4, %v61_v7  ;;  %v110_v19 = vsel %vm59_vm0, %v102_v12, %v63_v9  ;;  %v66_v20 = vrot.slane %v28_v15, 3  ;;  %v18_v21 = vld [vmem:[%s320_s0 + $0x3] sm:$0x1]  ;;  %v19_v28 = vld [vmem:[%s320_s0 + $0x4] sm:$0x1]  ;;  %120 = vst [vmem:[#allocation2 + $0x18] sm:$0xff] %v65_v24 }
   0x7   :  { %117 = vst [vmem:[#allocation2] sm:$0xff] %v109_v17  ;;  %118 = vst [vmem:[#allocation2 + $0x8] sm:$0xff] %v62_v18  ;;  %v69_v27 = vrot.slane %v30_v22, 3  ;;  %v32_v29 = vld [vmem:[%s322_s2 + $0x40] sm:$0xff]  ;;  %v104_v32 = vsel %vm100_vm1, %v18_v21, %v208_v3  ;;  %v70_v33 = vrot.slane %v31_v23, 3  ;;  %v105_v39 = vsel %vm100_vm1, %v19_v28, %v208_v3  ;;  %v38_v50 = vld [vmem:[%s322_s2 + $0x70] sm:$0xff] }
   0x8   :  { %119 = vst [vmem:[#allocation2 + $0x10] sm:$0xff] %v110_v19  ;;  %v111_v31 = vsel %vm59_vm0, %v103_v25, %v66_v20  ;;  %v72_v34 = vrot.slane %v32_v29, 3  ;;  %v33_v35 = vld [vmem:[%s322_s2 + $0x48] sm:$0x7]  ;;  %v20_v36 = vld [vmem:[%s320_s0 + $0x5] sm:$0x1]  ;;  %v68_v37 = vsel %vm59_vm0, %v66_v20, %v67_v26 }
   0x9   :  { %121 = vst [vmem:[#allocation2 + $0x20] sm:$0xff] %v111_v31  ;;  %v112_v38 = vsel %vm59_vm0, %v104_v32, %v69_v27  ;;  %v73_v40 = vrot.slane %v33_v35, 3  ;;  %v35_v41 = vld [vmem:[%s322_s2 + $0x58] sm:$0x7]  ;;  %v21_v42 = vld [vmem:[%s320_s0 + $0x6] sm:$0x1]  ;;  %v71_v44 = vsel %vm59_vm0, %v69_v27, %v70_v33  ;;  %v106_v47 = vsel %vm100_vm1, %v20_v36, %v208_v3 }
   0xa   :  { %v36_v43 = vld [vmem:[%s322_s2 + $0x60] sm:$0xff]  ;;  %122 = vst [vmem:[#allocation2 + $0x28] sm:$0xff] %v68_v37  ;;  %123 = vst [vmem:[#allocation2 + $0x30] sm:$0xff] %v112_v38  ;;  %v113_v45 = vsel %vm59_vm0, %v105_v39, %v72_v34  ;;  %v75_v46 = vrot.slane %v34_v30, 3  ;;  %v37_v48 = vld [vmem:[%s322_s2 + $0x68] sm:$0x7]  ;;  %v107_v54 = vsel %vm100_vm1, %v21_v42, %v208_v3 }
   0xb   :  { %v22_v49 = vld [vmem:[%s320_s0 + $0x7] sm:$0x1]  ;;  %124 = vst [vmem:[#allocation2 + $0x38] sm:$0xff] %v71_v44  ;;  %125 = vst [vmem:[#allocation2 + $0x40] sm:$0xff] %v113_v45  ;;  %v74_v51 = vsel %vm59_vm0, %v72_v34, %v73_v40  ;;  %v76_v52 = vrot.slane %v35_v41, 3  ;;  %v78_v53 = vrot.slane %v36_v43, 3 }
   0xc   :  { %v39_v55 = vld [vmem:[%s322_s2 + $0x78] sm:$0x7] }
   0xd   :  { %8 = vsyncpa [#allocation3], 0  ;;  %126 = vst [vmem:[#allocation2 + $0x48] sm:$0xff] %v74_v51  ;;  %v114_v56 = vsel %vm59_vm0, %v106_v47, %v75_v46  ;;  %v79_v57 = vrot.slane %v37_v48, 3  ;;  %v81_v58 = vrot.slane %v38_v50, 3  ;;  %v108_v59 = vsel %vm100_vm1, %v22_v49, %v208_v3  ;;  %s176_s0 = smov [#allocation2]  }
   0xe   :  { %127 = vst [vmem:[#allocation2 + $0x50] sm:$0xff] %v114_v56  ;;  %v77_v60 = vsel %vm59_vm0, %v75_v46, %v76_v52  ;;  %v115_v61 = vsel %vm59_vm0, %v107_v54, %v78_v53  ;;  %v82_v62 = vrot.slane %v39_v55, 3  ;;  %s138_s6 = sshll.u32 %s176_s0, 4  ;;  %s139_s6 = int_to_ptr.vmem [resolvable:$true] %s138_s6 }
   0xf   :  { %128 = vst [vmem:[#allocation2 + $0x58] sm:$0xff] %v77_v60  ;;  %129 = vst [vmem:[#allocation2 + $0x60] sm:$0xff] %v115_v61  ;;  %v80_v63 = vsel %vm59_vm0, %v78_v53, %v79_v57  ;;  %v116_v0 = vsel %vm59_vm0, %v108_v59, %v81_v58  ;;  %s152_s2 = scalar_lea.vmem %s139_s6, 2048  ;;  %p157_p1 = scmp.lt.s32.totalorder %s139_s6, %s139_s6 }
  0x10   :  { %130 = vst [vmem:[#allocation2 + $0x68] sm:$0xff] %v80_v63  ;;  %131 = vst [vmem:[#allocation2 + $0x70] sm:$0xff] %v116_v0  ;;  %v83_v1 = vsel %vm59_vm0, %v81_v58, %v82_v62  ;;  %p153_p0 = scmp.ne.s32.totalorder %s139_s6, %s152_s2  ;;  %p158_p2 = scmp.lt.s32.totalorder %s152_s2, %s152_s2 }
  0x11   :  { %132 = vst [vmem:[#allocation2 + $0x78] sm:$0xff] %v83_v1 }
  0x12   :  { %p159_p3 = por %p158_p2, %p157_p1 }
  0x14   :  { %p160_p4 = pnand %p159_p3, %p153_p0 }
  0x16   :  { %163 = shalt.err (!%p160_p4)
}
  0x17   :  { %s164_s9 = scalar_lea.hbm %s323_s3, 2048 }
  0x18   :  { %p165_p5 = scmp.ne.s32.totalorder %s323_s3, %s164_s9  ;;  %p168_p6 = scmp.lt.u32.totalorder %s164_s9, %s323_s3 }
  0x1a   :  { %p170_p7 = pnand %p168_p6, %p165_p5 }
  0x1c   :  { %173 = shalt.err (!%p170_p7)
}
  0x1d   :  { %s177_s14 = smov 128   ;;  %s178_s15 = smov 8  }
  0x1e   :  { %144 = dma.vmem_to_hbm [thread:$0]  %s139_s6, 2048, %s323_s3, [#allocation3], %s177_s14, %s177_s14, %s178_s15  }
  0x1f   :  { %174 = dma.done.wait [#allocation3], 2048  }
  0x20   :  { %175 = vsyncadd [#allocation3], 4294965248 }
  0x21   :  { %148 = vsyncpa [#allocation3], 1 }

</bundles_post_ra>
